<compile_context>
chip_gen: v7x
topology: tpu7x:2x2x1
jax: 0.10.0
libtpu: 0.0.40
codegen_flags: <defaults>
</compile_context>

<pallas_src>
import jax
import jax.numpy as jnp
from jax.experimental import pallas as pl
from jax.experimental.pallas import tpu as pltpu

_LANE = 128
# Conservative double-buffered working-set budget: leaves headroom inside
# v7x's 64 MiB physical VMEM; raised above the 16/32 MiB scoped defaults via
# vmem_limit_bytes where needed.
_VMEM_WORKING_BUDGET = 40 * 1024 * 1024


def _round_up(x, m):
    return (x + m - 1) // m * m


def _working_set_bytes(tb, d, chunk, itemsize):
    """Double-buffered VMEM working set for one grid step."""
    x_bytes = tb * d * itemsize          # activation batch tile
    w_bytes = d * chunk * itemsize       # weight-slab lane chunk
    b_bytes = chunk * 4                  # f32 bias chunk
    o_bytes = tb * chunk * 4             # f32 stacked-logits tile
    return 2 * (x_bytes + w_bytes + b_bytes + o_bytes)


def pack_max_ensemble_params(weights, biases, compute_dtype=jnp.bfloat16,
                             vmem_budget_bytes=_VMEM_WORKING_BUDGET):
    """Pack per-member linear params into one lane-dense slab.

    Call ONCE at parameter-load time (hoisted out of the per-call path).
    weights: [N, D, K], biases: [N, K].
    Returns (w_all [D, NK_pad], b_all [1, NK_pad] f32, meta) where slab column
    n*K + k holds member n / class k; NK_pad is padded so the chosen lane
    chunk divides it.
    """
    N, D, K = weights.shape
    itemsize = jnp.dtype(compute_dtype).itemsize
    NK = N * K
    NK_pad = _round_up(NK, _LANE)

    # Largest lane chunk whose double-buffered working set fits the budget
    # (sized with the largest batch tile, 256 rows, to stay conservative).
    chunk = NK_pad
    while chunk > _LANE and _working_set_bytes(256, D, chunk, itemsize) > vmem_budget_bytes:
        chunk = max(_LANE, _round_up(chunk // 2, _LANE))
    # TODO(synk): if even a 128-lane chunk overflows the budget (huge D), the
    #             contraction dim D would also need tiling; not needed here.
    NK_pad = _round_up(NK_pad, chunk)

    w_all = jnp.transpose(weights, (1, 0, 2)).reshape(D, NK)      # [D, N*K]
    w_all = jnp.pad(w_all, ((0, 0), (0, NK_pad - NK))).astype(compute_dtype)
    b_all = biases.reshape(1, NK).astype(jnp.float32)             # keep f32
    b_all = jnp.pad(b_all, ((0, 0), (0, NK_pad - NK)))

    return w_all, b_all, (N, D, K, chunk)


def _ensemble_logits_kernel(x_ref, w_ref, b_ref, o_ref):
    # One MXU matmul per (batch-tile, lane-chunk): all ensemble members'
    # output columns are packed along lanes, so the whole ensemble head is a
    # single fused matmul stream.  f32 accumulation on the MXU, f32 bias add
    # on the VPU, lane-dense unmasked store.
    o_ref[...] = (
        jnp.dot(x_ref[...], w_ref[...], preferred_element_type=jnp.float32)
        + b_ref[...]
    )


def max_ensemble(x, w_all, b_all, meta):
    """MaxEnsemble forward: max over linear ensemble members.

    x: [B, C, H, W] (or [B, D]); packed params from pack_max_ensemble_params.
    Returns [B, K] = max_n (flatten(x) @ W_n + b_n).
    """
    N, D, K, chunk = meta
    B = x.shape[0]
    compute_dtype = w_all.dtype
    itemsize = jnp.dtype(compute_dtype).itemsize
    NK_pad = w_all.shape[1]

    x_flat = x.reshape(B, D).astype(compute_dtype)

    # Batch padding: bf16 packs two rows per sublane -> round to 16; f32 to 8.
    row_align = 16 if itemsize == 2 else 8
    B_pad = _round_up(B, row_align)
    # Batch tile: single tile for small batches; 128 rows mid-size / f32;
    # 256 rows for large bf16 batches (fills the 256-wide MXU on v6e/v7x).
    if B_pad <= 128:
        tb = B_pad
    elif B_pad < 512 or itemsize != 2:
        tb = 128
        B_pad = _round_up(B_pad, tb)
    else:
        tb = 256
        B_pad = _round_up(B_pad, tb)

    x_p = x_flat
    if B_pad != B:
        x_p = jnp.pad(x_flat, ((0, B_pad - B), (0, 0)))

    working = _working_set_bytes(tb, D, chunk, itemsize)
    vmem_limit = int(min(64 * 1024 * 1024,
                         max(32 * 1024 * 1024, working * 5 // 4)))

    grid = (B_pad // tb, NK_pad // chunk)

    stacked = pl.pallas_call(
        _ensemble_logits_kernel,
        out_shape=jax.ShapeDtypeStruct((B_pad, NK_pad), jnp.float32),
        grid_spec=pltpu.PrefetchScalarGridSpec(
            num_scalar_prefetch=0,
            grid=grid,
            in_specs=[
                pl.BlockSpec((tb, D), lambda i, j: (i, 0)),     # x batch tile
                pl.BlockSpec((D, chunk), lambda i, j: (0, j)),  # weight chunk
                pl.BlockSpec((1, chunk), lambda i, j: (0, j)),  # bias chunk
            ],
            out_specs=pl.BlockSpec((tb, chunk), lambda i, j: (i, j)),
        ),
        compiler_params=pltpu.CompilerParams(
            # Batch tiles and lane chunks are independent -> both axes shard
            # across TensorCores; chunked weight DMA pipelines under the MXU.
            dimension_semantics=("parallel", "parallel"),
            vmem_limit_bytes=vmem_limit,
        ),
    )(x_p, w_all, b_all)

    # Strip padding, then fold the ensemble axis.  Equivalent to the module's
    # stack on dim 1 + torch.max(res, 1).values; done on the tiny [B, N*K]
    # result so member widths K need not be 128-lane aligned in the slab.
    logits = stacked[:B, : N * K].reshape(B, N, K)
    return jnp.max(logits, axis=1)


def _reference_max_ensemble(x, weights, biases):
    B = x.shape[0]
    N, D, K = weights.shape
    xf = x.reshape(B, D)
    per_net = [xf @ weights[n] + biases[n] for n in range(N)]
    return jnp.max(jnp.stack(per_net, axis=1), axis=1)


if __name__ == "__main__":
    key = jax.random.PRNGKey(0)

    # ---- Config 1: module-sized example, bf16 compute (default), one chunk.
    B, C, H, W = 2, 4, 16, 16
    N_NETS, NUM_CLASSES = 3, 10
    D = C * H * W

    kx, kw, kb = jax.random.split(key, 3)
    x = jax.random.normal(kx, (B, C, H, W), dtype=jnp.float32)
    weights = jax.random.normal(kw, (N_NETS, D, NUM_CLASSES), jnp.float32) * 0.02
    biases = jax.random.normal(kb, (N_NETS, NUM_CLASSES), jnp.float32) * 0.1

    w_all, b_all, meta = pack_max_ensemble_params(weights, biases)   # hoisted
    out = jax.block_until_ready(max_ensemble(x, w_all, b_all, meta))
    ref = _reference_max_ensemble(x, weights, biases)
    assert out.shape == (B, NUM_CLASSES)
    assert jnp.allclose(out, ref, atol=3e-2, rtol=3e-2), "bf16 path mismatch"

    # ---- Config 2: same shapes, f32 compute path (tight tolerance).
    w32, b32, meta32 = pack_max_ensemble_params(weights, biases,
                                                compute_dtype=jnp.float32)
    out32 = jax.block_until_ready(max_ensemble(x, w32, b32, meta32))
    assert jnp.allclose(out32, ref, atol=1e-4, rtol=1e-4), "f32 path mismatch"

    # ---- Config 3: multi batch-tile + forced lane chunking (exercises the
    # VMEM-budget fallback path with an artificially small budget).
    B3, C3, H3, W3 = 144, 2, 16, 16
    N3, K3 = 4, 96
    D3 = C3 * H3 * W3
    k1, k2, k3 = jax.random.split(jax.random.PRNGKey(1), 3)
    x3 = jax.random.normal(k1, (B3, C3, H3, W3), jnp.float32)
    w3 = jax.random.normal(k2, (N3, D3, K3), jnp.float32) * 0.02
    b3 = jax.random.normal(k3, (N3, K3), jnp.float32) * 0.1
    w3p, b3p, meta3 = pack_max_ensemble_params(w3, b3, vmem_budget_bytes=1 << 20)
    assert meta3[3] == 128   # budget forces 128-lane chunks (3 of them)
    out3 = jax.block_until_ready(max_ensemble(x3, w3p, b3p, meta3))
    ref3 = _reference_max_ensemble(x3, w3, b3)
    assert out3.shape == (B3, K3)
    assert jnp.allclose(out3, ref3, atol=3e-2, rtol=3e-2), "chunked path mismatch"

    print("KERNEL_OK")
</pallas_src>

<mosaic_0001>
module attributes {stable_mosaic.version = 11 : i64} {
  func.func @_ensemble_logits_kernel(%arg0: i32, %arg1: i32, %arg2: memref<16x1024xbf16, #tpu.memory_space<vmem>>, %arg3: memref<1024x128xbf16, #tpu.memory_space<vmem>>, %arg4: memref<1x128xf32, #tpu.memory_space<vmem>>, %arg5: memref<16x128xf32, #tpu.memory_space<vmem>>) attributes {dimension_semantics = [#tpu.dimension_semantics<parallel>, #tpu.dimension_semantics<parallel>], iteration_bounds = array<i64: 1, 1>, scalar_prefetch = 0 : i64, scratch_operands = 0 : i64, tpu.core_type = #tpu.core_type<tc>, window_params = [{transform_indices = @transform_0, window_bounds = array<i64: 16, 1024>}, {transform_indices = @transform_1, window_bounds = array<i64: 1024, 128>}, {transform_indices = @transform_2, window_bounds = array<i64: 1, 128>}, {transform_indices = @transform_3, window_bounds = array<i64: 16, 128>}]} {
    %c0 = arith.constant 0 : index
    %c0_0 = arith.constant 0 : index
    %0 = vector.load %arg2[%c0, %c0_0] : memref<16x1024xbf16, #tpu.memory_space<vmem>>, vector<16x1024xbf16>
    %c0_1 = arith.constant 0 : index
    %c0_2 = arith.constant 0 : index
    %1 = vector.load %arg3[%c0_1, %c0_2] : memref<1024x128xbf16, #tpu.memory_space<vmem>>, vector<1024x128xbf16>
    %cst = arith.constant dense<0.000000e+00> : vector<16x128xf32>
    %2 = tpu.matmul %0, %1, %cst {dimension_numbers = #tpu.dot_dimension_numbers<[1], [0], [0], [1], [0, 0, 1, 1], [], []>} : vector<16x1024xbf16>, vector<1024x128xbf16>, vector<16x128xf32> -> vector<16x128xf32>
    %c0_3 = arith.constant 0 : index
    %c0_4 = arith.constant 0 : index
    %3 = vector.load %arg4[%c0_3, %c0_4] : memref<1x128xf32, #tpu.memory_space<vmem>>, vector<1x128xf32>
    %4 = vector.broadcast %3 : vector<1x128xf32> to vector<16x128xf32>
    %5 = arith.addf %2, %4 : vector<16x128xf32>
    %c0_5 = arith.constant 0 : index
    %c0_6 = arith.constant 0 : index
    %6 = vector.load %arg5[%c0_5, %c0_6] : memref<16x128xf32, #tpu.memory_space<vmem>>, vector<16x128xf32>
    tpu.vector_store %arg5[%c0_5, %c0_6], %5 {strides = array<i32>} : memref<16x128xf32, #tpu.memory_space<vmem>>, vector<16x128xf32>,
    return
  }
  func.func @transform_0(%arg0: i32, %arg1: i32) -> (i32, i32) {
    %c0_i32 = arith.constant 0 : i32
    %c0_i32_0 = arith.constant 0 : i32
    return %arg0, %c0_i32 : i32, i32
  }
  func.func @transform_1(%arg0: i32, %arg1: i32) -> (i32, i32) {
    %c0_i32 = arith.constant 0 : i32
    %c0_i32_0 = arith.constant 0 : i32
    return %c0_i32, %arg1 : i32, i32
  }
  func.func @transform_2(%arg0: i32, %arg1: i32) -> (i32, i32) {
    %c0_i32 = arith.constant 0 : i32
    %c0_i32_0 = arith.constant 0 : i32
    return %c0_i32, %arg1 : i32, i32
  }
  func.func @transform_3(%arg0: i32, %arg1: i32) -> (i32, i32) {
    %c0_i32 = arith.constant 0 : i32
    return %arg0, %arg1 : i32, i32
  }
}

</mosaic_0001>

<bundles_post_ra>
// kernel: tpu_custom_call.1
= control target key start
LH: loop header
LB: loop body
LE: loop exit
PB: predicated region body
PF: predicated region fallthrough
CT: control target
= control target key end

     0   :  { %8 = vsyncpa [#allocation3], 0  ;;  %s1169_s0 = inlined_call_operand.hbm [shape: bf16[16,1024], index: 0, kind: input, shape index: {}]   ;;  %s1170_s1 = inlined_call_operand.hbm [shape: bf16[1024,128], index: 1, kind: input, shape index: {}]   ;;  %s1171_s2 = inlined_call_operand.vmem [shape: f32[1,128], index: 2, kind: input, shape index: {}]   ;;  %s1172_s3 = inlined_call_operand.hbm [shape: f32[16,128], index: 3, kind: output, shape index: {}]  }
   0x1   :  { %9 = vsyncpa [#allocation6], 0 }
   0x2   :  { %10 = vsyncpa [#allocation4], 0  ;;  %s1101_s12 = smov [#allocation2]   ;;  %s1029_s16 = scalar_lea.hbm %s1169_s0, 1024 }
   0x3   :  { %s16_s13 = sshll.u32 %s1101_s12, 4  ;;  %p1030_p0 = scmp.ne.s32.totalorder %s1169_s0, %s1029_s16  ;;  %s17_s13 = int_to_ptr.vmem [resolvable:$true] %s16_s13 }
   0x4   :  { %p1033_p1 = scmp.lt.u32.totalorder %s1029_s16, %s1169_s0 }
   0x6   :  { %p1035_p2 = pnand %p1033_p1, %p1030_p0 }
   0x8   :  { %1038 = shalt.err (!%p1035_p2)
}
   0x9   :  { %s1039_s21 = scalar_lea.vmem %s17_s13, 1024  ;;  %p1044_p4 = scmp.lt.s32.totalorder %s17_s13, %s17_s13 }
   0xa   :  { %p1040_p3 = scmp.ne.s32.totalorder %s17_s13, %s1039_s21  ;;  %p1045_p5 = scmp.lt.s32.totalorder %s1039_s21, %s1039_s21 }
   0xc   :  { %p1046_p6 = por %p1045_p5, %p1044_p4 }
   0xe   :  { %p1047_p7 = pnand %p1046_p6, %p1040_p3 }
  0x10   :  { %1050 = shalt.err (!%p1047_p7)
}
  0x11   :  { %s1102_s22 = smov 512   ;;  %s1103_s23 = smov 32  }
  0x12   :  { %22 = dma.hbm_to_vmem [thread:$0]  %s1169_s0, 1024, %s17_s13, [#allocation3], %s1102_s22, %s1102_s22, %s1103_s23  }
  0x13   :  { %s1104_s26 = smov [#allocation5]   ;;  %s1051_s30 = scalar_lea.hbm %s1170_s1, 8192 }
  0x14   :  { %s28_s27 = sshll.u32 %s1104_s26, 4  ;;  %p1052_p8 = scmp.ne.s32.totalorder %s1170_s1, %s1051_s30  ;;  %s29_s27 = int_to_ptr.vmem [resolvable:$true] %s28_s27 }
  0x15   :  { %p1055_p9 = scmp.lt.u32.totalorder %s1051_s30, %s1170_s1 }
  0x17   :  { %p1057_p10 = pnand %p1055_p9, %p1052_p8 }
  0x19   :  { %1060 = shalt.err (!%p1057_p10)
}
  0x1a   :  { %s1061_s8 = scalar_lea.vmem %s29_s27, 8192  ;;  %p1066_p12 = scmp.lt.s32.totalorder %s29_s27, %s29_s27 }
  0x1b   :  { %p1062_p11 = scmp.ne.s32.totalorder %s29_s27, %s1061_s8  ;;  %p1067_p13 = scmp.lt.s32.totalorder %s1061_s8, %s1061_s8 }
  0x1d   :  { %p1068_p0 = por %p1067_p13, %p1066_p12 }
  0x1f   :  { %p1069_p1 = pnand %p1068_p0, %p1062_p11 }
  0x21   :  { %1072 = shalt.err (!%p1069_p1)
}
  0x22   :  { %s1105_s0 = smov 64   ;;  %s1106_s9 = smov 4  }
  0x23   :  { %34 = dma.hbm_to_vmem [thread:$0]  %s1170_s1, 8192, %s29_s27, [#allocation6], %s1105_s0, %s1105_s0, %s1106_s9  }
  0x24   :  { %1095 = dma.done.wait [#allocation3], 1024  }
  0x25   :  { %1096 = vsyncadd [#allocation3], 4294966272 }
  0x26   :  { %1097 = dma.done.wait [#allocation6], 8192  }
  0x27   :  { %1098 = vsyncadd [#allocation6], 4294959104  ;;  %v965_v0 = vld [vmem:[#allocation5 + $0x40] sm:$0xff]   ;;  %v969_v4 = vld [vmem:[#allocation5 + $0x48] sm:$0xff]  }
  0x28   :  { %v966_v1 = vld [vmem:[#allocation5 + $0xc0] sm:$0xff]   ;;  %868 = vmatprep.subr.bf16.mxu0 %v965_v0  ;;  %v970_v5 = vld [vmem:[#allocation5 + $0xc8] sm:$0xff]   ;;  %v973_v8 = vld [vmem:[#allocation5 + $0x50] sm:$0xff]  }
  0x29   :  { %v967_v2 = vld [vmem:[#allocation5] sm:$0xff]   ;;  %890 = vmatprep.subr.bf16.mxu1 %v966_v1  ;;  %v971_v6 = vld [vmem:[#allocation5 + $0x8] sm:$0xff]   ;;  %v974_v9 = vld [vmem:[#allocation5 + $0xd0] sm:$0xff]  }
  0x2a   :  { %v968_v3 = vld [vmem:[#allocation5 + $0x80] sm:$0xff]   ;;  %869 = vmatpush3.bf16.msra.mxu0 %v967_v2  ;;  %v972_v7 = vld [vmem:[#allocation5 + $0x88] sm:$0xff]   ;;  %v975_v10 = vld [vmem:[#allocation5 + $0x10] sm:$0xff]  }
  0x2b   :  { %891 = vmatpush3.bf16.msra.mxu1 %v968_v3  ;;  %870 = vmatprep.subr.bf16.mxu0 %v969_v4  ;;  %v976_v11 = vld [vmem:[#allocation5 + $0x90] sm:$0xff]   ;;  %v977_v12 = vld [vmem:[#allocation5 + $0x58] sm:$0xff]   ;;  %v981_v16 = vld [vmem:[#allocation5 + $0x60] sm:$0xff]  }
  0x2c   :  { %892 = vmatprep.subr.bf16.mxu1 %v970_v5  ;;  %v978_v13 = vld [vmem:[#allocation5 + $0xd8] sm:$0xff]   ;;  %v982_v17 = vld [vmem:[#allocation5 + $0xe0] sm:$0xff]   ;;  %v985_v20 = vld [vmem:[#allocation5 + $0x68] sm:$0xff]  }
  0x2d   :  { %v979_v14 = vld [vmem:[#allocation5 + $0x18] sm:$0xff]   ;;  %v983_v18 = vld [vmem:[#allocation5 + $0x20] sm:$0xff]   ;;  %v986_v21 = vld [vmem:[#allocation5 + $0xe8] sm:$0xff]  }
  0x2e   :  { %871 = vmatpush3.bf16.msra.mxu0 %v971_v6  ;;  %v980_v15 = vld [vmem:[#allocation5 + $0x98] sm:$0xff]   ;;  %v984_v19 = vld [vmem:[#allocation5 + $0xa0] sm:$0xff]   ;;  %v987_v22 = vld [vmem:[#allocation5 + $0x28] sm:$0xff]  }
  0x2f   :  { %893 = vmatpush3.bf16.msra.mxu1 %v972_v7  ;;  %872 = vmatprep.subr.bf16.mxu0 %v973_v8  ;;  %v988_v23 = vld [vmem:[#allocation5 + $0xa8] sm:$0xff]   ;;  %v989_v24 = vld [vmem:[#allocation5 + $0x70] sm:$0xff]   ;;  %v993_v28 = vld [vmem:[#allocation5 + $0x78] sm:$0xff]  }
  0x30   :  { %894 = vmatprep.subr.bf16.mxu1 %v974_v9  ;;  %v990_v25 = vld [vmem:[#allocation5 + $0xf0] sm:$0xff]   ;;  %v994_v29 = vld [vmem:[#allocation5 + $0xf8] sm:$0xff]   ;;  %v44_v32 = vld [vmem:[#allocation2] sm:$0xff] }
  0x31   :  { %v991_v26 = vld [vmem:[#allocation5 + $0x30] sm:$0xff]   ;;  %v995_v30 = vld [vmem:[#allocation5 + $0x38] sm:$0xff]   ;;  %v48_v33 = vld [vmem:[#allocation2 + $0x20] sm:$0xff] }
  0x32   :  { %873 = vmatpush3.bf16.msra.mxu0 %v975_v10  ;;  %v992_v27 = vld [vmem:[#allocation5 + $0xb0] sm:$0xff]   ;;  %v996_v31 = vld [vmem:[#allocation5 + $0xb8] sm:$0xff]   ;;  %v45_v34 = vld [vmem:[#allocation2 + $0x8] sm:$0xff]  ;;  %v796_v35 = vcombine.low %v44_v32, %v48_v33  ;;  %v797_v36 = vcombine.high %v44_v32, %v48_v33 }
  0x33   :  { %895 = vmatpush3.bf16.msra.mxu1 %v976_v11  ;;  %874 = vmatprep.subr.bf16.mxu0 %v977_v12  ;;  %v49_v37 = vld [vmem:[#allocation2 + $0x28] sm:$0xff]  ;;  %v997_v40 = vld [vmem:[#allocation5 + $0x140] sm:$0xff]   ;;  %v1005_v48 = vld [vmem:[#allocation5 + $0x150] sm:$0xff]  }
  0x34   :  { %896 = vmatprep.subr.bf16.mxu1 %v978_v13  ;;  %v798_v38 = vcombine.low %v45_v34, %v49_v37  ;;  %v799_v39 = vcombine.high %v45_v34, %v49_v37  ;;  %643 = vmatprep.mubr.bf16.mxu0 %v797_v36  ;;  %v998_v41 = vld [vmem:[#allocation5 + $0x1c0] sm:$0xff]   ;;  %v1001_v44 = vld [vmem:[#allocation5 + $0x148] sm:$0xff]   ;;  %v1006_v49 = vld [vmem:[#allocation5 + $0x1d0] sm:$0xff]  }
  0x35   :  { %v999_v42 = vld [vmem:[#allocation5 + $0x100] sm:$0xff]   ;;  %v1002_v45 = vld [vmem:[#allocation5 + $0x1c8] sm:$0xff]   ;;  %v1007_v50 = vld [vmem:[#allocation5 + $0x110] sm:$0xff]  }
  0x36   :  { %875 = vmatpush3.bf16.msra.mxu0 %v979_v14  ;;  %684 = vmatprep.mubr.bf16.mxu1 %v799_v39  ;;  %v1000_v43 = vld [vmem:[#allocation5 + $0x180] sm:$0xff]   ;;  %v1003_v46 = vld [vmem:[#allocation5 + $0x108] sm:$0xff]   ;;  %v1008_v51 = vld [vmem:[#allocation5 + $0x190] sm:$0xff]  }
  0x37   :  { %897 = vmatpush3.bf16.msra.mxu1 %v980_v15  ;;  %876 = vmatprep.subr.bf16.mxu0 %v981_v16  ;;  %v1004_v47 = vld [vmem:[#allocation5 + $0x188] sm:$0xff]   ;;  %v1009_v52 = vld [vmem:[#allocation5 + $0x158] sm:$0xff]   ;;  %v1013_v56 = vld [vmem:[#allocation5 + $0x160] sm:$0xff]  }
  0x38   :  { %898 = vmatprep.subr.bf16.mxu1 %v982_v17  ;;  %v1010_v53 = vld [vmem:[#allocation5 + $0x1d8] sm:$0xff]   ;;  %v1014_v57 = vld [vmem:[#allocation5 + $0x1e0] sm:$0xff]   ;;  %v1017_v60 = vld [vmem:[#allocation5 + $0x168] sm:$0xff]  }
  0x39   :  { %v1011_v54 = vld [vmem:[#allocation5 + $0x118] sm:$0xff]   ;;  %v1015_v58 = vld [vmem:[#allocation5 + $0x120] sm:$0xff]   ;;  %v1018_v61 = vld [vmem:[#allocation5 + $0x1e8] sm:$0xff]  }
  0x3a   :  { %877 = vmatpush3.bf16.msra.mxu0 %v983_v18  ;;  %v1012_v55 = vld [vmem:[#allocation5 + $0x198] sm:$0xff]   ;;  %v1016_v59 = vld [vmem:[#allocation5 + $0x1a0] sm:$0xff]   ;;  %v1019_v62 = vld [vmem:[#allocation5 + $0x128] sm:$0xff]  }
  0x3b   :  { %899 = vmatpush3.bf16.msra.mxu1 %v984_v19  ;;  %878 = vmatprep.subr.bf16.mxu0 %v985_v20  ;;  %v1020_v63 = vld [vmem:[#allocation5 + $0x1a8] sm:$0xff]   ;;  %v1021_v0 = vld [vmem:[#allocation5 + $0x170] sm:$0xff]   ;;  %v1025_v4 = vld [vmem:[#allocation5 + $0x178] sm:$0xff]  }
  0x3c   :  { %900 = vmatprep.subr.bf16.mxu1 %v986_v21  ;;  %v1022_v1 = vld [vmem:[#allocation5 + $0x1f0] sm:$0xff]   ;;  %v1026_v5 = vld [vmem:[#allocation5 + $0x1f8] sm:$0xff]   ;;  %v795_v18 = vld [vmem:[%s1171_s2] ss:$0 sm:$0xff]  ;;  %s1107_s2 = smov [#allocation7]  }
  0x3d   :  { %v1023_v2 = vld [vmem:[#allocation5 + $0x130] sm:$0xff]   ;;  %v1027_v6 = vld [vmem:[#allocation5 + $0x138] sm:$0xff]   ;;  %s782_s13 = sshll.u32 %s1107_s2, 4  ;;  %s783_s13 = int_to_ptr.vmem [resolvable:$true] %s782_s13 }
  0x3e   :  { %879 = vmatpush3.bf16.msra.mxu0 %v987_v22  ;;  %v1024_v3 = vld [vmem:[#allocation5 + $0x1b0] sm:$0xff]   ;;  %v1028_v7 = vld [vmem:[#allocation5 + $0x1b8] sm:$0xff]   ;;  %s1073_s14 = scalar_lea.vmem %s783_s13, 256  ;;  %p1078_p3 = scmp.lt.s32.totalorder %s783_s13, %s783_s13 }
  0x3f   :  { %901 = vmatpush3.bf16.msra.mxu1 %v988_v23  ;;  %880 = vmatprep.subr.bf16.mxu0 %v989_v24  ;;  %v46_v8 = vld [vmem:[#allocation2 + $0x10] sm:$0xff]  ;;  %v47_v12 = vld [vmem:[#allocation2 + $0x18] sm:$0xff]  ;;  %p1074_p2 = scmp.ne.s32.totalorder %s783_s13, %s1073_s14  ;;  %p1079_p4 = scmp.lt.s32.totalorder %s1073_s14, %s1073_s14 }
  0x40   :  { %902 = vmatprep.subr.bf16.mxu1 %v990_v25  ;;  %v50_v9 = vld [vmem:[#allocation2 + $0x30] sm:$0xff]  ;;  %v51_v13 = vld [vmem:[#allocation2 + $0x38] sm:$0xff] }
  0x41   :  { %v800_v10 = vcombine.low %v46_v8, %v50_v9  ;;  %v801_v11 = vcombine.high %v46_v8, %v50_v9  ;;  %v802_v14 = vcombine.low %v47_v12, %v51_v13  ;;  %v803_v15 = vcombine.high %v47_v12, %v51_v13  ;;  %p1080_p5 = por %p1079_p4, %p1078_p3 }
  0x42   :  { %881 = vmatpush3.bf16.msra.mxu0 %v991_v26 }
  0x43   :  { %903 = vmatpush3.bf16.msra.mxu1 %v992_v27  ;;  %882 = vmatprep.subr.bf16.mxu0 %v993_v28  ;;  %p1081_p6 = pnand %p1080_p5, %p1074_p2 }
  0x44   :  { %904 = vmatprep.subr.bf16.mxu1 %v994_v29 }
  0x46   :  { %883 = vmatpush3.bf16.msra.mxu0 %v995_v30 }
  0x47   :  { %905 = vmatpush3.bf16.msra.mxu1 %v996_v31  ;;  %912 = vmatprep.subr.bf16.mxu0 %v997_v40 }
  0x48   :  { %934 = vmatprep.subr.bf16.mxu1 %v998_v41 }
  0x49   :  { %644 = vmatmul.mubr.bf16.vlgmr.msra.gmra.mrb[0].mxu0 %v796_v35 }
  0x4a   :  { %685 = vmatmul.mubr.bf16.vlgmr.msra.gmra.mrb[0].mxu1 %v798_v38  ;;  %913 = vmatpush3.bf16.msra.mxu0 %v999_v42 }
  0x4b   :  { %935 = vmatpush3.bf16.msra.mxu1 %v1000_v43  ;;  %914 = vmatprep.subr.bf16.mxu0 %v1001_v44 }
  0x4c   :  { %936 = vmatprep.subr.bf16.mxu1 %v1002_v45  ;;  %725 = vmatprep.mubr.bf16.mxu0 %v801_v11 }
  0x4d   :  { %766 = vmatprep.mubr.bf16.mxu1 %v803_v15 }
  0x4e   :  { %915 = vmatpush3.bf16.msra.mxu0 %v1003_v46 }
  0x4f   :  { %937 = vmatpush3.bf16.msra.mxu1 %v1004_v47  ;;  %916 = vmatprep.subr.bf16.mxu0 %v1005_v48 }
  0x50   :  { %938 = vmatprep.subr.bf16.mxu1 %v1006_v49 }
  0x52   :  { %917 = vmatpush3.bf16.msra.mxu0 %v1007_v50 }
  0x53   :  { %939 = vmatpush3.bf16.msra.mxu1 %v1008_v51  ;;  %918 = vmatprep.subr.bf16.mxu0 %v1009_v52 }
  0x54   :  { %940 = vmatprep.subr.bf16.mxu1 %v1010_v53 }
  0x56   :  { %919 = vmatpush3.bf16.msra.mxu0 %v1011_v54 }
  0x57   :  { %941 = vmatpush3.bf16.msra.mxu1 %v1012_v55  ;;  %920 = vmatprep.subr.bf16.mxu0 %v1013_v56 }
  0x58   :  { %942 = vmatprep.subr.bf16.mxu1 %v1014_v57 }
  0x5a   :  { %921 = vmatpush3.bf16.msra.mxu0 %v1015_v58 }
  0x5b   :  { %943 = vmatpush3.bf16.msra.mxu1 %v1016_v59  ;;  %922 = vmatprep.subr.bf16.mxu0 %v1017_v60 }
  0x5c   :  { %944 = vmatprep.subr.bf16.mxu1 %v1018_v61 }
  0x5e   :  { %923 = vmatpush3.bf16.msra.mxu0 %v1019_v62 }
  0x5f   :  { %945 = vmatpush3.bf16.msra.mxu1 %v1020_v63  ;;  %924 = vmatprep.subr.bf16.mxu0 %v1021_v0 }
  0x60   :  { %946 = vmatprep.subr.bf16.mxu1 %v1022_v1 }
  0x62   :  { %925 = vmatpush3.bf16.msra.mxu0 %v1023_v2 }
  0x63   :  { %947 = vmatpush3.bf16.msra.mxu1 %v1024_v3  ;;  %926 = vmatprep.subr.bf16.mxu0 %v1025_v4 }
  0x64   :  { %948 = vmatprep.subr.bf16.mxu1 %v1026_v5 }
  0x66   :  { %927 = vmatpush3.bf16.msra.mxu0 %v1027_v6 }
  0x67   :  { %949 = vmatpush3.bf16.msra.mxu1 %v1028_v7 }
  0x69   :  { %726 = vmatmul.mubr.bf16.vlgmr.msra.gmra.mrb[4].mxu0 %v800_v10 }
  0x6a   :  { %767 = vmatmul.mubr.bf16.vlgmr.msra.gmra.mrb[4].mxu1 %v802_v14 }
 0x11c   :  { %v884_v16 = vpop.f32.mrb[0].mxu0 }
 0x11d   :  { %v906_v17 = vpop.f32.mrb[0].mxu1  ;;  %v885_v19 = vpop.f32.mrb[1].mxu0 }
 0x11e   :  { %v886_v20 = vadd.f32 %v885_v19, %v884_v16  ;;  %v907_v21 = vpop.f32.mrb[1].mxu1  ;;  %v887_v22 = vpop.f32.mrb[2].mxu0 }
 0x11f   :  { %v908_v23 = vadd.f32 %v907_v21, %v906_v17  ;;  %v909_v24 = vpop.f32.mrb[2].mxu1  ;;  %v888_v25 = vpop.f32.mrb[3].mxu0 }
 0x120   :  { %v646_v26 = vadd.f32 %v886_v20, %v795_v18  ;;  %v889_v27 = vadd.f32 %v888_v25, %v887_v22  ;;  %v910_v28 = vpop.f32.mrb[3].mxu1 }
 0x121   :  { %v911_v29 = vadd.f32 %v910_v28, %v909_v24 }
 0x122   :  { %v687_v30 = vadd.f32 %v908_v23, %v646_v26  ;;  %v649_v31 = vadd.f32 %v889_v27, %v795_v18 }
 0x124   :  { %v690_v32 = vadd.f32 %v911_v29, %v649_v31 }
 0x13c   :  { %v928_v33 = vpop.f32.mrb[4].mxu0 }
 0x13d   :  { %v950_v34 = vpop.f32.mrb[4].mxu1  ;;  %v929_v35 = vpop.f32.mrb[5].mxu0 }
 0x13e   :  { %v930_v36 = vadd.f32 %v929_v35, %v928_v33  ;;  %v951_v37 = vpop.f32.mrb[5].mxu1  ;;  %v931_v38 = vpop.f32.mrb[6].mxu0 }
 0x13f   :  { %v952_v39 = vadd.f32 %v951_v37, %v950_v34  ;;  %v953_v40 = vpop.f32.mrb[6].mxu1  ;;  %v932_v41 = vpop.f32.mrb[7].mxu0 }
 0x140   :  { %v728_v42 = vadd.f32 %v930_v36, %v687_v30  ;;  %v933_v43 = vadd.f32 %v932_v41, %v931_v38  ;;  %v954_v44 = vpop.f32.mrb[7].mxu1 }
 0x141   :  { %v955_v45 = vadd.f32 %v954_v44, %v953_v40 }
 0x142   :  { %v769_v46 = vadd.f32 %v952_v39, %v728_v42  ;;  %v731_v47 = vadd.f32 %v933_v43, %v690_v32 }
 0x144   :  { %775 = vst [vmem:[#allocation7] sm:$0xff] %v769_v46  ;;  %v772_v48 = vadd.f32 %v955_v45, %v731_v47 }
 0x146   :  { %776 = vst [vmem:[#allocation7 + $0x8] sm:$0xff] %v772_v48 }
 0x147   :  { %1084 = shalt.err (!%p1081_p6)
}
 0x148   :  { %s1085_s17 = scalar_lea.hbm %s1172_s3, 256 }
 0x149   :  { %p1086_p7 = scmp.ne.s32.totalorder %s1172_s3, %s1085_s17  ;;  %p1089_p8 = scmp.lt.u32.totalorder %s1085_s17, %s1172_s3 }
 0x14b   :  { %p1091_p9 = pnand %p1089_p8, %p1086_p7 }
 0x14d   :  { %1094 = shalt.err (!%p1091_p9)
}
 0x14e   :  { %s1108_s22 = smov 128   ;;  %s1109_s23 = smov 8  }
 0x14f   :  { %788 = dma.vmem_to_hbm [thread:$0]  %s783_s13, 256, %s1172_s3, [#allocation4], %s1108_s22, %s1108_s22, %s1109_s23  }
 0x150   :  { %1099 = dma.done.wait [#allocation4], 256  }
 0x151   :  { %1100 = vsyncadd [#allocation4], 4294967040 }
 0x152   :  { %792 = vsyncpa [#allocation3], 1 }
 0x153   :  { %793 = vsyncpa [#allocation6], 1 }
 0x154   :  { %794 = vsyncpa [#allocation4], 1 }

</bundles_post_ra>
